<compile_context>
chip_gen: v5e
topology: v5e:2x2
jax: 0.10.0
libtpu: 0.0.40
codegen_flags: <defaults>
</compile_context>

<pallas_src>
import jax
import jax.numpy as jnp
from jax.experimental import pallas as pl
from jax.experimental.pallas import tpu as pltpu


def _round_up(x, m):
    return ((x + m - 1) // m) * m


def _choose_tile(dim, max_tile):
    """Largest nice tile (multiple of 128) that divides `dim` (128-aligned)."""
    for t in (512, 384, 256, 128):
        if t <= max_tile and dim % t == 0:
            return t
    return dim


def _choose_k_tile(k, max_tile):
    """Tile K only when it is a large multiple of 128; otherwise one K step
    (a block dim equal to the full array dim is always legal)."""
    if k <= max_tile or k % 128 != 0:
        return k
    for t in (512, 384, 256, 128):
        if t <= max_tile and k % t == 0:
            return t
    return k


def _linear_bias_kernel(x_ref, w_ref, b_ref, o_ref, acc_ref):
    # x_ref:   (TILE_M, TILE_K)  activation tile
    # w_ref:   (TILE_N, TILE_K)  weight tile, PyTorch (out, in) layout
    # b_ref:   (1, TILE_N)       bias tile (f32)
    # o_ref:   (TILE_M, TILE_N)  lane-dense output tile
    # acc_ref: (TILE_M, TILE_N)  f32 accumulator (persists across the K axis)
    k = pl.program_id(2)

    @pl.when(k == 0)
    def _():
        acc_ref[...] = jnp.zeros_like(acc_ref)

    acc_ref[...] += jax.lax.dot_general(
        x_ref[...], w_ref[...],
        dimension_numbers=(((1,), (1,)), ((), ())),   # contract K against K
        preferred_element_type=jnp.float32,
    )

    @pl.when(k == pl.num_programs(2) - 1)
    def _():
        # f32 epilogue (v5e has no bf16 VPU path).
        o_ref[...] = (acc_ref[...] + b_ref[...]).astype(o_ref.dtype)


def _linear_nobias_kernel(x_ref, w_ref, o_ref, acc_ref):
    k = pl.program_id(2)

    @pl.when(k == 0)
    def _():
        acc_ref[...] = jnp.zeros_like(acc_ref)

    acc_ref[...] += jax.lax.dot_general(
        x_ref[...], w_ref[...],
        dimension_numbers=(((1,), (1,)), ((), ())),
        preferred_element_type=jnp.float32,
    )

    @pl.when(k == pl.num_programs(2) - 1)
    def _():
        o_ref[...] = acc_ref[...].astype(o_ref.dtype)


def prepare_linear_params(weight, bias=None, *, use_bf16=False):
    """Pad / cast nn.Linear parameters ONCE, outside the per-call hot path.

    weight: (N, K) float32  (PyTorch convention: (out_features, in_features))
    bias:   (N,)   float32 or None
    """
    N, K = weight.shape
    n_pad = _round_up(N, 128)                 # lane-dense weight rows / output
    w = weight if n_pad == N else jnp.pad(weight, ((0, n_pad - N), (0, 0)))
    if use_bf16:
        # Halves weight HBM traffic, peak-rate MXU; accumulation stays f32.
        w = w.astype(jnp.bfloat16)
    b = None
    if bias is not None:
        b = jnp.pad(bias.astype(jnp.float32), (0, n_pad - N)).reshape(1, n_pad)
    return {"weight": w, "bias": b, "out_features": N, "use_bf16": use_bf16}


def linear_regression_forward(x, params, *, tile_m=512, max_tile_n=512,
                              max_tile_k=512):
    """Pallas forward of LinearRegression: x @ weight.T (+ bias).

    x: (..., K) float32; params from prepare_linear_params. Returns (..., N).
    """
    w = params["weight"]                      # (n_pad, K), f32 or bf16
    b = params["bias"]                        # (1, n_pad) f32 or None
    N = params["out_features"]
    n_pad, K = w.shape

    lead_shape = x.shape[:-1]
    assert x.shape[-1] == K
    x2 = x.reshape(-1, K)
    M = x2.shape[0]
    out_dtype = x.dtype

    if params["use_bf16"]:
        x2 = x2.astype(jnp.bfloat16)

    # M tiling: 512 for real batches, otherwise the 8-aligned batch itself.
    # (On v7x, N-axis tiles also provide >=2 grid points for megacore when M
    # is small and N is large.)
    tm = min(tile_m, _round_up(M, 8))
    m_pad = _round_up(M, tm)
    if m_pad != M:
        # Only the activation may get a small ragged-tile pad; parameters were
        # padded once in prepare_linear_params.
        x2 = jnp.pad(x2, ((0, m_pad - M), (0, 0)))

    tn = _choose_tile(n_pad, max_tile_n)
    tk = _choose_k_tile(K, max_tile_k)
    grid = (m_pad // tm, n_pad // tn, K // tk)

    itemsize = jnp.dtype(out_dtype).itemsize
    cost = pl.CostEstimate(
        flops=2 * M * K * N,
        transcendentals=0,
        bytes_accessed=(M * K + N * K + M * N) * itemsize,
    )

    x_spec = pl.BlockSpec((tm, tk), lambda i, j, k: (i, k))
    w_spec = pl.BlockSpec((tn, tk), lambda i, j, k: (j, k))
    out_spec = pl.BlockSpec((tm, tn), lambda i, j, k: (i, j))

    common = dict(
        out_shape=jax.ShapeDtypeStruct((m_pad, n_pad), out_dtype),
        grid=grid,
        out_specs=out_spec,
        scratch_shapes=[pltpu.VMEM((tm, tn), jnp.float32)],
        compiler_params=pltpu.CompilerParams(
            # M / N tiles independent; K is the reduction axis.
            dimension_semantics=("parallel", "parallel", "arbitrary"),
            # Explicit budget sized for v7x's 64 MiB physical VMEM; live
            # buffers at 512-wide tiles are ~7 MiB, so ample headroom.
            vmem_limit_bytes=40 * 1024 * 1024,
        ),
        cost_estimate=cost,
    )

    if b is not None:
        b_spec = pl.BlockSpec((1, tn), lambda i, j, k: (0, j))
        out = pl.pallas_call(
            _linear_bias_kernel, in_specs=[x_spec, w_spec, b_spec], **common
        )(x2, w, b)
    else:
        out = pl.pallas_call(
            _linear_nobias_kernel, in_specs=[x_spec, w_spec], **common
        )(x2, w)

    out = out[:M, :N]
    return out.reshape(lead_shape + (N,))


if __name__ == "__main__":
    key = jax.random.PRNGKey(0)
    k_x, k_w, k_b, k_x2, k_w2, k_b2 = jax.random.split(key, 6)

    # --- Small case matching the module's toy usage: batch=8, 32 -> 16 ------
    batch, input_size, output_size = 8, 32, 16
    x = jax.random.normal(k_x, (batch, input_size), dtype=jnp.float32)
    bound = 1.0 / (input_size ** 0.5)
    weight = jax.random.uniform(k_w, (output_size, input_size),
                                dtype=jnp.float32, minval=-bound, maxval=bound)
    bias = jax.random.uniform(k_b, (output_size,), dtype=jnp.float32,
                              minval=-bound, maxval=bound)

    params = prepare_linear_params(weight, bias)
    out = jax.block_until_ready(linear_regression_forward(x, params))
    ref = x @ weight.T + bias
    assert out.shape == (batch, output_size)
    assert jnp.allclose(out, ref, atol=1e-5, rtol=1e-5)

    # No-bias variant (bias=False in the module constructor).
    params_nb = prepare_linear_params(weight, None)
    out_nb = jax.block_until_ready(linear_regression_forward(x, params_nb))
    assert jnp.allclose(out_nb, x @ weight.T, atol=1e-5, rtol=1e-5)

    # --- Larger case exercising N streaming + K reduction tiling ------------
    M2, K2, N2 = 272, 1024, 384
    x_big = jax.random.normal(k_x2, (M2, K2), dtype=jnp.float32)
    bound2 = 1.0 / (K2 ** 0.5)
    w_big = jax.random.uniform(k_w2, (N2, K2), dtype=jnp.float32,
                               minval=-bound2, maxval=bound2)
    b_big = jax.random.uniform(k_b2, (N2,), dtype=jnp.float32,
                               minval=-bound2, maxval=bound2)
    params_big = prepare_linear_params(w_big, b_big)
    out_big = jax.block_until_ready(linear_regression_forward(x_big, params_big))
    ref_big = x_big @ w_big.T + b_big
    assert out_big.shape == (M2, N2)
    # Looser tolerance: f32 matmul precision on the MXU differs slightly
    # from XLA's default-precision reference matmul.
    assert jnp.allclose(out_big, ref_big, atol=2e-2, rtol=2e-2)

    print("KERNEL_OK")
</pallas_src>

<mosaic_0001>
module attributes {stable_mosaic.version = 11 : i64} {
  func.func @_linear_bias_kernel(%arg0: i32, %arg1: i32, %arg2: i32, %arg3: memref<8x32xf32, #tpu.memory_space<vmem>>, %arg4: memref<128x32xf32, #tpu.memory_space<vmem>>, %arg5: memref<1x128xf32, #tpu.memory_space<vmem>>, %arg6: memref<8x128xf32, #tpu.memory_space<vmem>>, %arg7: memref<8x128xf32, #tpu.memory_space<vmem>>) attributes {dimension_semantics = [#tpu.dimension_semantics<parallel>, #tpu.dimension_semantics<parallel>, #tpu.dimension_semantics<arbitrary>], iteration_bounds = array<i64: 1, 1, 1>, scalar_prefetch = 0 : i64, scratch_operands = 1 : i64, tpu.core_type = #tpu.core_type<tc>, window_params = [{transform_indices = @transform_0, window_bounds = array<i64: 8, 32>}, {transform_indices = @transform_1, window_bounds = array<i64: 128, 32>}, {transform_indices = @transform_2, window_bounds = array<i64: 1, 128>}, {transform_indices = @transform_3, window_bounds = array<i64: 8, 128>}]} {
    %c0_i32 = arith.constant 0 : i32
    %0 = arith.cmpi eq, %arg2, %c0_i32 : i32
    %1 = arith.extui %0 : i1 to i32
    %c0_i32_0 = arith.constant 0 : i32
    %2 = arith.cmpi ne, %1, %c0_i32_0 : i32
    scf.if %2 {
      %cst_10 = arith.constant 0.000000e+00 : f32
      %12 = vector.broadcast %cst_10 : f32 to vector<8x128xf32>
      %c0_11 = arith.constant 0 : index
      %c0_12 = arith.constant 0 : index
      %13 = vector.load %arg7[%c0_11, %c0_12] : memref<8x128xf32, #tpu.memory_space<vmem>>, vector<8x128xf32>
      tpu.vector_store %arg7[%c0_11, %c0_12], %12 {strides = array<i32>} : memref<8x128xf32, #tpu.memory_space<vmem>>, vector<8x128xf32>,
    } else {
    }
    %c0 = arith.constant 0 : index
    %c0_1 = arith.constant 0 : index
    %3 = vector.load %arg7[%c0, %c0_1] : memref<8x128xf32, #tpu.memory_space<vmem>>, vector<8x128xf32>
    %c0_2 = arith.constant 0 : index
    %c0_3 = arith.constant 0 : index
    %4 = vector.load %arg3[%c0_2, %c0_3] : memref<8x32xf32, #tpu.memory_space<vmem>>, vector<8x32xf32>
    %c0_4 = arith.constant 0 : index
    %c0_5 = arith.constant 0 : index
    %5 = vector.load %arg4[%c0_4, %c0_5] : memref<128x32xf32, #tpu.memory_space<vmem>>, vector<128x32xf32>
    %cst = arith.constant dense<0.000000e+00> : vector<8x128xf32>
    %6 = tpu.matmul %4, %5, %cst {dimension_numbers = #tpu.dot_dimension_numbers<[1], [1], [0], [0], [0, 0, 1, 0], [], []>} : vector<8x32xf32>, vector<128x32xf32>, vector<8x128xf32> -> vector<8x128xf32>
    %7 = arith.addf %3, %6 : vector<8x128xf32>
    %c0_6 = arith.constant 0 : index
    %c0_7 = arith.constant 0 : index
    %8 = vector.load %arg7[%c0_6, %c0_7] : memref<8x128xf32, #tpu.memory_space<vmem>>, vector<8x128xf32>
    tpu.vector_store %arg7[%c0_6, %c0_7], %7 {strides = array<i32>} : memref<8x128xf32, #tpu.memory_space<vmem>>, vector<8x128xf32>,
    %c0_i32_8 = arith.constant 0 : i32
    %9 = arith.cmpi eq, %arg2, %c0_i32_8 : i32
    %10 = arith.extui %9 : i1 to i32
    %c0_i32_9 = arith.constant 0 : i32
    %11 = arith.cmpi ne, %10, %c0_i32_9 : i32
    scf.if %11 {
      %c0_10 = arith.constant 0 : index
      %c0_11 = arith.constant 0 : index
      %12 = vector.load %arg7[%c0_10, %c0_11] : memref<8x128xf32, #tpu.memory_space<vmem>>, vector<8x128xf32>
      %c0_12 = arith.constant 0 : index
      %c0_13 = arith.constant 0 : index
      %13 = vector.load %arg5[%c0_12, %c0_13] : memref<1x128xf32, #tpu.memory_space<vmem>>, vector<1x128xf32>
      %14 = vector.broadcast %13 : vector<1x128xf32> to vector<8x128xf32>
      %15 = arith.addf %12, %14 : vector<8x128xf32>
      %c0_14 = arith.constant 0 : index
      %c0_15 = arith.constant 0 : index
      %16 = vector.load %arg6[%c0_14, %c0_15] : memref<8x128xf32, #tpu.memory_space<vmem>>, vector<8x128xf32>
      tpu.vector_store %arg6[%c0_14, %c0_15], %15 {strides = array<i32>} : memref<8x128xf32, #tpu.memory_space<vmem>>, vector<8x128xf32>,
    } else {
    }
    return
  }
  func.func @transform_0(%arg0: i32, %arg1: i32, %arg2: i32) -> (i32, i32) {
    %c0_i32 = arith.constant 0 : i32
    return %arg0, %arg2 : i32, i32
  }
  func.func @transform_1(%arg0: i32, %arg1: i32, %arg2: i32) -> (i32, i32) {
    %c0_i32 = arith.constant 0 : i32
    return %arg1, %arg2 : i32, i32
  }
  func.func @transform_2(%arg0: i32, %arg1: i32, %arg2: i32) -> (i32, i32) {
    %c0_i32 = arith.constant 0 : i32
    %c0_i32_0 = arith.constant 0 : i32
    return %c0_i32, %arg1 : i32, i32
  }
  func.func @transform_3(%arg0: i32, %arg1: i32, %arg2: i32) -> (i32, i32) {
    %c0_i32 = arith.constant 0 : i32
    return %arg0, %arg1 : i32, i32
  }
}

</mosaic_0001>

<bundles_post_ra>
// kernel: tpu_custom_call.1
= control target key start
LH: loop header
LB: loop body
LE: loop exit
PB: predicated region body
PF: predicated region fallthrough
CT: control target
= control target key end

     0   :  { %vm38_vm0 = vcmask 261120   ;;  %s278_s0 = inlined_call_operand.vmem [shape: f32[8,32], index: 0, kind: input, shape index: {}]   ;;  %s279_s1 = inlined_call_operand.vmem [shape: f32[128,32], index: 1, kind: input, shape index: {}]   ;;  %s280_s2 = inlined_call_operand.vmem [shape: f32[1,128], index: 2, kind: input, shape index: {}]   ;;  %s281_s3 = inlined_call_operand.hbm [shape: f32[8,128], index: 3, kind: output, shape index: {}]  }
   0x1   :  { %v37_v0 = vld [vmem:[%s279_s1 + $0x78] sm:$0xff]  ;;  %v36_v1 = vld [vmem:[%s279_s1 + $0x70] sm:$0xff] }
   0x2   :  { %138 = vmatpush.xpose.msk.msra.mxu0 %vm38_vm0, %v37_v0 }
   0x3   :  { %8 = vsyncpa [#allocation4], 0  ;;  %v35_v2 = vld [vmem:[%s279_s1 + $0x68] sm:$0xff]  ;;  %v34_v3 = vld [vmem:[%s279_s1 + $0x60] sm:$0xff]  ;;  %s183_s21 = smov [#allocation3]   ;;  %s129_s25 = sshll.u32 %s281_s3, 4  ;;  %s130_s25 = int_to_ptr.hbm [resolvable:$true] %s129_s25 }
   0x4   :  { %v33_v4 = vld [vmem:[%s279_s1 + $0x58] sm:$0xff]  ;;  %v32_v5 = vld [vmem:[%s279_s1 + $0x50] sm:$0xff]  ;;  %v31_v6 = vld [vmem:[%s279_s1 + $0x48] sm:$0xff]  ;;  %s127_s22 = sshll.u32 %s183_s21, 4  ;;  %s128_s22 = int_to_ptr.vmem [resolvable:$true] %s127_s22 }
   0x5   :  { %v30_v7 = vld [vmem:[%s279_s1 + $0x40] sm:$0xff]  ;;  %v29_v8 = vld [vmem:[%s279_s1 + $0x38] sm:$0xff]  ;;  %v28_v9 = vld [vmem:[%s279_s1 + $0x30] sm:$0xff] }
   0x6   :  { %139 = vmatpush.xpose.msk.msra.mxu0 %vm38_vm0, %v36_v1  ;;  %v27_v10 = vld [vmem:[%s279_s1 + $0x28] sm:$0xff]  ;;  %v26_v11 = vld [vmem:[%s279_s1 + $0x20] sm:$0xff]  ;;  %v25_v12 = vld [vmem:[%s279_s1 + $0x18] sm:$0xff] }
   0x7   :  { %v24_v13 = vld [vmem:[%s279_s1 + $0x10] sm:$0xff]  ;;  %v23_v14 = vld [vmem:[%s279_s1 + $0x8] sm:$0xff]  ;;  %v22_v15 = vld [vmem:[%s279_s1] sm:$0xff] }
   0x8   :  { %v21_v16 = vld [vmem:[%s278_s0] sm:$0xff] }
   0x9   :  { %v156_v17 = vld [vmem:[%s280_s2] ss:$0 sm:$0xff] }
   0xa   :  { %140 = vmatpush.xpose.msk.msra.mxu0 %vm38_vm0, %v35_v2 }
   0xe   :  { %141 = vmatpush.xpose.msk.msra.mxu0 %vm38_vm0, %v34_v3 }
  0x12   :  { %142 = vmatpush.xpose.msk.msra.mxu0 %vm38_vm0, %v33_v4 }
  0x16   :  { %143 = vmatpush.xpose.msk.msra.mxu0 %vm38_vm0, %v32_v5 }
  0x1a   :  { %144 = vmatpush.xpose.msk.msra.mxu0 %vm38_vm0, %v31_v6 }
  0x1e   :  { %145 = vmatpush.xpose.msk.msra.mxu0 %vm38_vm0, %v30_v7 }
  0x22   :  { %146 = vmatpush.xpose.msk.msra.mxu0 %vm38_vm0, %v29_v8 }
  0x26   :  { %147 = vmatpush.xpose.msk.msra.mxu0 %vm38_vm0, %v28_v9 }
  0x2a   :  { %148 = vmatpush.xpose.msk.msra.mxu0 %vm38_vm0, %v27_v10 }
  0x2e   :  { %149 = vmatpush.xpose.msk.msra.mxu0 %vm38_vm0, %v26_v11 }
  0x32   :  { %150 = vmatpush.xpose.msk.msra.mxu0 %vm38_vm0, %v25_v12 }
  0x36   :  { %151 = vmatpush.xpose.msk.msra.mxu0 %vm38_vm0, %v24_v13 }
  0x3a   :  { %152 = vmatpush.xpose.msk.msra.mxu0 %vm38_vm0, %v23_v14 }
  0x3e   :  { %153 = vmatpush.xpose.msk.msra.mxu0 %vm38_vm0, %v22_v15 }
  0x41   :  { %154 = vmatmul.msk.f32.vlgmr.msra.gmra.mxu0 %vm38_vm0, %v21_v16 }
  0xbe   :  { %v107_v18 = vpop.f32.mrf.mxu0 }
  0xbf   :  { %v120_v19 = vadd.f32 %v156_v17, %v107_v18 }
  0xc1   :  { %121 = vst [vmem:[#allocation3] sm:$0xff] %v120_v19 }
  0xc2   :  { %132 = dma.vmem_to_hbm [thread:$0]  %s128_s22, 128, %s130_s25, [#allocation4]  }
  0xc3   :  { %181 = dma.done.wait [#allocation4], 128  }
  0xc4   :  { %182 = vsyncadd [#allocation4], 4294967168 }
  0xc5   :  { %137 = vsyncpa [#allocation4], 1 }

</bundles_post_ra>
